<compile_context>
chip_gen: v7x
topology: tpu7x:2x2x1
jax: 0.10.0
libtpu: 0.0.40
codegen_flags: <defaults>
</compile_context>

<pallas_src>
import functools

import jax
import jax.numpy as jnp
from jax.experimental import pallas as pl
from jax.experimental.pallas import tpu as pltpu


def _round_up(x, m):
    return (x + m - 1) // m * m


def _layernorm_bf16(x_f32, alpha, bias, *, eps, n_feat):
    """Torch-semantics LayerNorm on a [tm, F] f32 tile -> bf16 MXU operand."""
    mean = jnp.mean(x_f32, axis=-1, keepdims=True)                    # [tm, 1]
    centered = x_f32 - mean
    denom = max(n_feat - 1, 1)                                        # ddof=1; guard F == 1
    var = jnp.sum(centered * centered, axis=-1, keepdims=True) * (1.0 / denom)
    # Divide only on the [tm, 1] column, then broadcast-multiply (cheap VPU mul).
    inv = 1.0 / (jnp.sqrt(var) + eps)                                 # eps AFTER sqrt (torch .std)
    y = (alpha * centered) * inv + bias                               # [tm, F] f32
    return y.astype(jnp.bfloat16)


def _residual_kernel_full(x_ref, alpha_ref, bias_ref, w_ref, b_ref, o_ref,
                          *, eps, n_feat):
    """Weight fully resident ([F, F] block); 1-D grid over row tiles."""
    x = x_ref[...].astype(jnp.float32)                                # [tm, F]
    y = _layernorm_bf16(x, alpha_ref[...], bias_ref[...], eps=eps, n_feat=n_feat)
    z = jnp.dot(y, w_ref[...], preferred_element_type=jnp.float32) + b_ref[...]
    # dropout (eval mode) = identity; residual add in f32.
    o_ref[...] = (x + z).astype(o_ref.dtype)


def _residual_kernel_coltiled(x_ref, xcol_ref, alpha_ref, bias_ref, w_ref, b_ref,
                              o_ref, y_ref, *, eps, n_feat):
    """Weight column-tiled (large F). LN is computed ONCE per row tile (j == 0) and
    cached in a bf16 VMEM scratch that is reused for every column tile j, keeping the
    inner loop MXU-bound instead of VALU-bound."""
    @pl.when(pl.program_id(1) == 0)
    def _():
        x = x_ref[...].astype(jnp.float32)                            # [tm, F]
        y_ref[...] = _layernorm_bf16(x, alpha_ref[...], bias_ref[...],
                                     eps=eps, n_feat=n_feat)

    z = jnp.dot(y_ref[...], w_ref[...],
                preferred_element_type=jnp.float32) + b_ref[...]      # [tm, tn]
    o_ref[...] = (xcol_ref[...].astype(jnp.float32) + z).astype(o_ref.dtype)


def _vmem_budget_bytes():
    """Usable VMEM budget: ~80% of physical, leaving headroom for Mosaic-internal
    scratch.  v5e/v6e (128 MiB) -> ~102 MiB; v7x (64 MiB per TensorCore) -> ~51 MiB."""
    try:
        phys = int(pltpu.get_tpu_info().vmem_capacity_bytes)
    except Exception:
        phys = 64 << 20                    # conservative fallback
    return int(phys * 0.8)


def _vmem_estimate(tm, tn, F, col_tiled, in_bytes, out_bytes):
    est = 2 * tm * F * in_bytes            # x row tile (double-buffered)
    est += 2 * tm * tn * out_bytes         # output tile
    est += 2 * F * tn * 2                  # bf16 weight tile (double-buffered)
    est += 3 * tm * F * 4                  # [tm, F] f32 LN temporaries (centered/y/cast)
    est += 2 * (2 * F + tn) * 4            # alpha / bias / linear bias
    if col_tiled:
        est += 2 * tm * tn * in_bytes      # residual x column tile
        est += tm * F * 2                  # cached bf16 LN output (single copy)
    est += 2 << 20                         # slack
    return est


def _pick_tn(F, tn, budget):
    """Weight column tile: resident [F, F] when it fits comfortably, otherwise a
    column tile that is a multiple of 256 (full MXU N-width on v6e/v7x; also fine on
    v5e's 128-wide MXU)."""
    if tn is not None and F > tn and F % tn == 0 and tn % 256 == 0:
        return tn, True
    if 2 * F * F * 2 <= 0.4 * budget:      # double-buffered bf16 [F, F] weight
        return F, False
    for cand in (512, 256):
        if F > cand and F % cand == 0:
            return cand, True
    # TODO(synk): pad F to a multiple of 256 for odd feature sizes.
    return F, False


def residual_connection(x, alpha, bias, w, b, *, eps=1e-6, tm=None, tn=None):
    """x: [B, S, F]; alpha/bias: [F]; w: [F, F]; b: [F] -> [B, S, F].

    tm: row tile (rows of B*S per grid step); default 512 (col-tiled) / 1024 (resident
        weight), auto-shrunk to fit the per-generation VMEM budget.
    tn: weight column tile; must be a multiple of 256 (and divide F) to column-tile,
        otherwise the full [F, F] bf16 weight stays resident in VMEM.
    """
    assert eps > 0, "padded zero rows rely on eps > 0 (inv = 1/eps stays finite)"
    B, S, F = x.shape
    M = B * S
    in_bytes = jnp.dtype(x.dtype).itemsize
    out_bytes = in_bytes

    budget = _vmem_budget_bytes()
    tn, col_tiled = _pick_tn(F, tn, budget)

    # --- row tile -------------------------------------------------------------
    # Bigger tm => higher arithmetic intensity w.r.t. the streamed weight
    # ((M/tm)*F^2*2 B of HBM traffic); v6e needs tm ~512-1024 at large F to reach
    # the MXU roofline.
    if tm is None:
        tm = 512 if col_tiled else 1024
    tm = max(8, _round_up(min(tm, _round_up(M, 8)), 8))
    # Keep >= 2 row tiles on problems big enough to care, so the "parallel" i axis
    # shards across v7x's two TensorCores.
    if M >= 512:
        tm = min(tm, _round_up((M + 1) // 2, 8))
    # Shrink tm until the VMEM estimate fits the budget (handles v7x's 64 MiB).
    while tm > 8 and _vmem_estimate(tm, tn, F, col_tiled, in_bytes, out_bytes) > budget:
        tm = max(8, _round_up(tm // 2, 8))

    M_pad = _round_up(M, tm)

    x2 = x.reshape(M, F)
    if M_pad != M:
        # Zero rows are LN-safe: std == 0 -> inv = 1/eps (finite); rows sliced off.
        x2 = jnp.pad(x2, ((0, M_pad - M), (0, 0)))

    alpha2 = alpha.reshape(1, F).astype(jnp.float32)
    bias2 = bias.reshape(1, F).astype(jnp.float32)
    w_bf = w.astype(jnp.bfloat16)          # bf16 weights: MXU peak + half the VMEM/HBM traffic
    b2 = b.reshape(1, F).astype(jnp.float32)

    n_i = M_pad // tm
    vmem_limit = int(min(max(_vmem_estimate(tm, tn, F, col_tiled, in_bytes, out_bytes),
                             32 << 20), budget))
    cost = pl.CostEstimate(
        flops=int(2 * M_pad * F * F + 8 * M_pad * F),
        transcendentals=0,
        bytes_accessed=int(M_pad * F * in_bytes * (2 if col_tiled else 1)
                           + n_i * F * F * 2
                           + M_pad * F * out_bytes
                           + 3 * F * 4),
    )

    if col_tiled:
        grid = (n_i, F // tn)
        kernel = functools.partial(_residual_kernel_coltiled, eps=eps, n_feat=F)
        in_specs = [
            pl.BlockSpec((tm, F), lambda i, j: (i, 0)),     # full-F row tile (LN); fetched once per i
            pl.BlockSpec((tm, tn), lambda i, j: (i, j)),    # residual x column tile
            pl.BlockSpec((1, F), lambda i, j: (0, 0)),      # alpha
            pl.BlockSpec((1, F), lambda i, j: (0, 0)),      # bias
            # Weight is the only block whose index changes every inner step;
            # TODO(synk): pipeline_mode=pl.Buffered(3) here if its DMA shows up exposed.
            pl.BlockSpec((F, tn), lambda i, j: (0, j)),
            pl.BlockSpec((1, tn), lambda i, j: (0, j)),     # linear bias column
        ]
        out_spec = pl.BlockSpec((tm, tn), lambda i, j: (i, j))
        scratch = [pltpu.VMEM((tm, F), jnp.bfloat16)]       # cached LN output
        # j must be "arbitrary": the y scratch written at j == 0 is carried across the
        # j loop; i stays "parallel" for megacore / v7x sharding.
        dim_sem = ("parallel", "arbitrary")
        args = (x2, x2, alpha2, bias2, w_bf, b2)
    else:
        grid = (n_i,)
        kernel = functools.partial(_residual_kernel_full, eps=eps, n_feat=F)
        in_specs = [
            pl.BlockSpec((tm, F), lambda i: (i, 0)),
            pl.BlockSpec((1, F), lambda i: (0, 0)),         # alpha
            pl.BlockSpec((1, F), lambda i: (0, 0)),         # bias
            pl.BlockSpec((F, F), lambda i: (0, 0)),         # grid-invariant weight
            pl.BlockSpec((1, F), lambda i: (0, 0)),         # linear bias
        ]
        out_spec = pl.BlockSpec((tm, F), lambda i: (i, 0))
        scratch = []
        dim_sem = ("parallel",)
        args = (x2, alpha2, bias2, w_bf, b2)

    out = pl.pallas_call(
        kernel,
        out_shape=jax.ShapeDtypeStruct((M_pad, F), x.dtype),
        grid_spec=pltpu.PrefetchScalarGridSpec(
            num_scalar_prefetch=0,
            grid=grid,
            in_specs=in_specs,
            out_specs=out_spec,
            scratch_shapes=scratch,
        ),
        compiler_params=pltpu.CompilerParams(
            dimension_semantics=dim_sem,
            vmem_limit_bytes=vmem_limit,
        ),
        cost_estimate=cost,
    )(*args)

    return out[:M].reshape(B, S, F)


def _reference(x, alpha, bias, w, b, eps=1e-6):
    """Pure-JAX reference matching the module semantics; the sublayer matmul uses the
    same bf16-operand / f32-accumulate contract as the kernel."""
    xf = x.astype(jnp.float32)
    mean = jnp.mean(xf, axis=-1, keepdims=True)
    var = jnp.sum((xf - mean) ** 2, axis=-1, keepdims=True) / max(x.shape[-1] - 1, 1)
    std = jnp.sqrt(var)
    y = alpha * (xf - mean) / (std + eps) + bias
    z = jnp.dot(y.astype(jnp.bfloat16).astype(jnp.float32),
                w.astype(jnp.bfloat16).astype(jnp.float32)) + b
    return (xf + z).astype(x.dtype)


def _make_inputs(key, B, S, F):
    kx, kw, kb = jax.random.split(key, 3)
    x = jax.random.normal(kx, (B, S, F), dtype=jnp.float32)
    # LayerNormalization params as in __init__: ones / zeros.
    alpha = jnp.ones((F,), dtype=jnp.float32)
    bias = jnp.zeros((F,), dtype=jnp.float32)
    # Deterministic synthetic sublayer: Linear(F, F).
    w = jax.random.normal(kw, (F, F), dtype=jnp.float32) * (F ** -0.5)
    b = jax.random.normal(kb, (F,), dtype=jnp.float32) * 0.01
    return x, alpha, bias, w, b


if __name__ == "__main__":
    key = jax.random.PRNGKey(0)
    k1, k2 = jax.random.split(key)

    # Case 1: small lane-dense shape (resident-weight path, 1-D grid).
    x, alpha, bias, w, b = _make_inputs(k1, 2, 8, 128)
    out = jax.block_until_ready(residual_connection(x, alpha, bias, w, b))
    ref = _reference(x, alpha, bias, w, b)
    assert out.shape == x.shape
    assert jnp.allclose(out, ref, atol=2e-3, rtol=2e-3), "case 1 mismatch vs reference"

    # Case 2: ragged row count (B*S not a multiple of 8) + column-tiled weight with the
    # cached bf16 LN scratch (tn multiple of 256 for full MXU N-width on v6e/v7x).
    x, alpha, bias, w, b = _make_inputs(k2, 2, 11, 512)
    out = jax.block_until_ready(residual_connection(x, alpha, bias, w, b, tn=256))
    ref = _reference(x, alpha, bias, w, b)
    assert out.shape == x.shape
    assert jnp.allclose(out, ref, atol=2e-3, rtol=2e-3), "case 2 mismatch vs reference"

    print("KERNEL_OK")
</pallas_src>

<mosaic_0001>
module attributes {stable_mosaic.version = 11 : i64} {
  func.func @_residual_kernel_full(%arg0: i32, %arg1: memref<16x128xf32, #tpu.memory_space<vmem>>, %arg2: memref<1x128xf32, #tpu.memory_space<vmem>>, %arg3: memref<1x128xf32, #tpu.memory_space<vmem>>, %arg4: memref<128x128xbf16, #tpu.memory_space<vmem>>, %arg5: memref<1x128xf32, #tpu.memory_space<vmem>>, %arg6: memref<16x128xf32, #tpu.memory_space<vmem>>) attributes {dimension_semantics = [#tpu.dimension_semantics<parallel>], iteration_bounds = array<i64: 1>, scalar_prefetch = 0 : i64, scratch_operands = 0 : i64, tpu.core_type = #tpu.core_type<tc>, window_params = [{transform_indices = @transform_0, window_bounds = array<i64: 16, 128>}, {pipeline_mode = #tpu.pipeline_mode<synchronous>, transform_indices = @transform_1, window_bounds = array<i64: 1, 128>}, {pipeline_mode = #tpu.pipeline_mode<synchronous>, transform_indices = @transform_2, window_bounds = array<i64: 1, 128>}, {pipeline_mode = #tpu.pipeline_mode<synchronous>, transform_indices = @transform_3, window_bounds = array<i64: 128, 128>}, {pipeline_mode = #tpu.pipeline_mode<synchronous>, transform_indices = @transform_4, window_bounds = array<i64: 1, 128>}, {transform_indices = @transform_5, window_bounds = array<i64: 16, 128>}]} {
    %c0 = arith.constant 0 : index
    %c0_0 = arith.constant 0 : index
    %0 = vector.load %arg1[%c0, %c0_0] : memref<16x128xf32, #tpu.memory_space<vmem>>, vector<16x128xf32>
    %c0_1 = arith.constant 0 : index
    %c0_2 = arith.constant 0 : index
    %1 = vector.load %arg2[%c0_1, %c0_2] : memref<1x128xf32, #tpu.memory_space<vmem>>, vector<1x128xf32>
    %c0_3 = arith.constant 0 : index
    %c0_4 = arith.constant 0 : index
    %2 = vector.load %arg3[%c0_3, %c0_4] : memref<1x128xf32, #tpu.memory_space<vmem>>, vector<1x128xf32>
    %cst = arith.constant dense<0.000000e+00> : vector<16xf32>
    %3 = vector.multi_reduction <add>, %0, %cst [1] : vector<16x128xf32> to vector<16xf32>
    %4 = vector.shape_cast %3 : vector<16xf32> to vector<16x1xf32>
    %cst_5 = arith.constant 1.280000e+02 : f32
    %5 = vector.broadcast %cst_5 : f32 to vector<16x1xf32>
    %6 = arith.divf %4, %5 : vector<16x1xf32>
    %7 = vector.broadcast %6 : vector<16x1xf32> to vector<16x128xf32>
    %8 = arith.subf %0, %7 : vector<16x128xf32>
    %9 = arith.mulf %8, %8 : vector<16x128xf32>
    %cst_6 = arith.constant dense<0.000000e+00> : vector<16xf32>
    %10 = vector.multi_reduction <add>, %9, %cst_6 [1] : vector<16x128xf32> to vector<16xf32>
    %11 = vector.shape_cast %10 : vector<16xf32> to vector<16x1xf32>
    %cst_7 = arith.constant 0.00787401571 : f32
    %12 = vector.broadcast %cst_7 : f32 to vector<16x1xf32>
    %13 = arith.mulf %11, %12 : vector<16x1xf32>
    %14 = math.sqrt %13 : vector<16x1xf32>
    %cst_8 = arith.constant 9.99999997E-7 : f32
    %15 = vector.broadcast %cst_8 : f32 to vector<16x1xf32>
    %16 = arith.addf %14, %15 : vector<16x1xf32>
    %cst_9 = arith.constant 1.000000e+00 : f32
    %17 = vector.broadcast %cst_9 : f32 to vector<16x1xf32>
    %18 = arith.divf %17, %16 : vector<16x1xf32>
    %19 = vector.broadcast %1 : vector<1x128xf32> to vector<16x128xf32>
    %20 = arith.mulf %19, %8 : vector<16x128xf32>
    %21 = vector.broadcast %18 : vector<16x1xf32> to vector<16x128xf32>
    %22 = arith.mulf %20, %21 : vector<16x128xf32>
    %23 = vector.broadcast %2 : vector<1x128xf32> to vector<16x128xf32>
    %24 = arith.addf %22, %23 : vector<16x128xf32>
    %25 = arith.truncf %24 : vector<16x128xf32> to vector<16x128xbf16>
    %c0_10 = arith.constant 0 : index
    %c0_11 = arith.constant 0 : index
    %26 = vector.load %arg4[%c0_10, %c0_11] : memref<128x128xbf16, #tpu.memory_space<vmem>>, vector<128x128xbf16>
    %cst_12 = arith.constant dense<0.000000e+00> : vector<16x128xf32>
    %27 = tpu.matmul %25, %26, %cst_12 {dimension_numbers = #tpu.dot_dimension_numbers<[1], [0], [0], [1], [0, 0, 1, 1], [], []>} : vector<16x128xbf16>, vector<128x128xbf16>, vector<16x128xf32> -> vector<16x128xf32>
    %c0_13 = arith.constant 0 : index
    %c0_14 = arith.constant 0 : index
    %28 = vector.load %arg5[%c0_13, %c0_14] : memref<1x128xf32, #tpu.memory_space<vmem>>, vector<1x128xf32>
    %29 = vector.broadcast %28 : vector<1x128xf32> to vector<16x128xf32>
    %30 = arith.addf %27, %29 : vector<16x128xf32>
    %31 = arith.addf %0, %30 : vector<16x128xf32>
    %c0_15 = arith.constant 0 : index
    %c0_16 = arith.constant 0 : index
    %32 = vector.load %arg6[%c0_15, %c0_16] : memref<16x128xf32, #tpu.memory_space<vmem>>, vector<16x128xf32>
    tpu.vector_store %arg6[%c0_15, %c0_16], %31 {strides = array<i32>} : memref<16x128xf32, #tpu.memory_space<vmem>>, vector<16x128xf32>,
    return
  }
  func.func @transform_0(%arg0: i32) -> (i32, i32) {
    %c0_i32 = arith.constant 0 : i32
    %c0_i32_0 = arith.constant 0 : i32
    return %arg0, %c0_i32 : i32, i32
  }
  func.func @transform_1(%arg0: i32) -> (i32, i32) {
    %c0_i32 = arith.constant 0 : i32
    %c0_i32_0 = arith.constant 0 : i32
    %c0_i32_1 = arith.constant 0 : i32
    return %c0_i32, %c0_i32_0 : i32, i32
  }
  func.func @transform_2(%arg0: i32) -> (i32, i32) {
    %c0_i32 = arith.constant 0 : i32
    %c0_i32_0 = arith.constant 0 : i32
    %c0_i32_1 = arith.constant 0 : i32
    return %c0_i32, %c0_i32_0 : i32, i32
  }
  func.func @transform_3(%arg0: i32) -> (i32, i32) {
    %c0_i32 = arith.constant 0 : i32
    %c0_i32_0 = arith.constant 0 : i32
    %c0_i32_1 = arith.constant 0 : i32
    return %c0_i32, %c0_i32_0 : i32, i32
  }
  func.func @transform_4(%arg0: i32) -> (i32, i32) {
    %c0_i32 = arith.constant 0 : i32
    %c0_i32_0 = arith.constant 0 : i32
    %c0_i32_1 = arith.constant 0 : i32
    return %c0_i32, %c0_i32_0 : i32, i32
  }
  func.func @transform_5(%arg0: i32) -> (i32, i32) {
    %c0_i32 = arith.constant 0 : i32
    %c0_i32_0 = arith.constant 0 : i32
    return %arg0, %c0_i32 : i32, i32
  }
}

</mosaic_0001>

<bundles_post_ra>
// kernel: tpu_custom_call.1
= control target key start
LH: loop header
LB: loop body
LE: loop exit
PB: predicated region body
PF: predicated region fallthrough
CT: control target
= control target key end

     0   :  { %10 = vsyncpa [#allocation3], 0  ;;  %s481_s0 = inlined_call_operand.hbm [shape: f32[16,128], index: 0, kind: input, shape index: {}]   ;;  %s482_s1 = inlined_call_operand.vmem [shape: f32[1,128], index: 1, kind: input, shape index: {}]   ;;  %s483_s2 = inlined_call_operand.vmem [shape: f32[1,128], index: 2, kind: input, shape index: {}]   ;;  %s484_s3 = inlined_call_operand.hbm [shape: bf16[128,128], index: 3, kind: input, shape index: {}]   ;;  %s485_s4 = inlined_call_operand.vmem [shape: f32[1,128], index: 4, kind: input, shape index: {}]   ;;  %s486_s5 = inlined_call_operand.hbm [shape: f32[16,128], index: 5, kind: output, shape index: {}]  }
   0x1   :  { %11 = vsyncpa [#allocation6], 0 }
   0x2   :  { %12 = vsyncpa [#allocation4], 0  ;;  %s381_s18 = smov [#allocation2]   ;;  %s309_s22 = scalar_lea.hbm %s481_s0, 256 }
   0x3   :  { %s18_s19 = sshll.u32 %s381_s18, 4  ;;  %p310_p0 = scmp.ne.s32.totalorder %s481_s0, %s309_s22  ;;  %s19_s19 = int_to_ptr.vmem [resolvable:$true] %s18_s19 }
   0x4   :  { %p313_p1 = scmp.lt.u32.totalorder %s309_s22, %s481_s0 }
   0x6   :  { %p315_p2 = pnand %p313_p1, %p310_p0 }
   0x8   :  { %318 = shalt.err (!%p315_p2)
}
   0x9   :  { %s319_s27 = scalar_lea.vmem %s19_s19, 256  ;;  %p324_p4 = scmp.lt.s32.totalorder %s19_s19, %s19_s19 }
   0xa   :  { %p320_p3 = scmp.ne.s32.totalorder %s19_s19, %s319_s27  ;;  %p325_p5 = scmp.lt.s32.totalorder %s319_s27, %s319_s27 }
   0xc   :  { %p326_p6 = por %p325_p5, %p324_p4 }
   0xe   :  { %p327_p7 = pnand %p326_p6, %p320_p3 }
  0x10   :  { %330 = shalt.err (!%p327_p7)
}
  0x11   :  { %s382_s28 = smov 128   ;;  %s383_s29 = smov 8  }
  0x12   :  { %24 = dma.hbm_to_vmem [thread:$0]  %s481_s0, 256, %s19_s19, [#allocation3], %s382_s28, %s382_s28, %s383_s29  }
  0x13   :  { %s384_s7 = smov [#allocation5]   ;;  %s331_s11 = scalar_lea.hbm %s484_s3, 1024 }
  0x14   :  { %s34_s8 = sshll.u32 %s384_s7, 4  ;;  %p332_p8 = scmp.ne.s32.totalorder %s484_s3, %s331_s11  ;;  %s35_s8 = int_to_ptr.vmem [resolvable:$true] %s34_s8 }
  0x15   :  { %p335_p9 = scmp.lt.u32.totalorder %s331_s11, %s484_s3 }
  0x17   :  { %p337_p10 = pnand %p335_p9, %p332_p8 }
  0x19   :  { %340 = shalt.err (!%p337_p10)
}
  0x1a   :  { %s341_s16 = scalar_lea.vmem %s35_s8, 1024  ;;  %p346_p12 = scmp.lt.s32.totalorder %s35_s8, %s35_s8 }
  0x1b   :  { %p342_p11 = scmp.ne.s32.totalorder %s35_s8, %s341_s16  ;;  %p347_p13 = scmp.lt.s32.totalorder %s341_s16, %s341_s16 }
  0x1d   :  { %p348_p0 = por %p347_p13, %p346_p12 }
  0x1f   :  { %p349_p1 = pnand %p348_p0, %p342_p11 }
  0x21   :  { %352 = shalt.err (!%p349_p1)
}
  0x22   :  { %s385_s0 = smov 64   ;;  %s386_s17 = smov 4  }
  0x23   :  { %40 = dma.hbm_to_vmem [thread:$0]  %s484_s3, 1024, %s35_s8, [#allocation6], %s385_s0, %s385_s0, %s386_s17  }
  0x24   :  { %375 = dma.done.wait [#allocation3], 256  }
  0x25   :  { %376 = vsyncadd [#allocation3], 4294967040 }
  0x26   :  { %377 = dma.done.wait [#allocation6], 1024  }
  0x27   :  { %378 = vsyncadd [#allocation6], 4294966272  ;;  %v447_v0 = vld [vmem:[#allocation2] sm:$0xff]  ;;  %v449_v1 = vld [vmem:[#allocation2 + $0x8] sm:$0xff]  ;;  %v387_v11 = vmov 0.0   ;;  %vm388_vm0 = vmmov 0  }
  0x28   :  { %54 = vadd.xlane.f32.xlu0 %v447_v0  ;;  %v293_v10 = vld [vmem:[#allocation5] sm:$0xff]   ;;  %264 = vmatprep.subr.bf16.mxu0 %v387_v11  ;;  %v294_v12 = vld [vmem:[#allocation5 + $0x8] sm:$0xff]   ;;  %v295_v13 = vld [vmem:[#allocation5 + $0x10] sm:$0xff]  }
  0x29   :  { %265 = vmatpush3.bf16.msra.mxu0 %v293_v10  ;;  %v296_v14 = vld [vmem:[#allocation5 + $0x18] sm:$0xff]   ;;  %280 = vmatprep.mubr.msk.bf16.mxu0 %vm388_vm0, %v387_v11  ;;  %v297_v15 = vld [vmem:[#allocation5 + $0x20] sm:$0xff]   ;;  %v298_v16 = vld [vmem:[#allocation5 + $0x28] sm:$0xff]  }
  0x2a   :  { %266 = vmatprep.subr.bf16.mxu0 %v387_v11  ;;  %v299_v17 = vld [vmem:[#allocation5 + $0x30] sm:$0xff]   ;;  %v300_v18 = vld [vmem:[#allocation5 + $0x38] sm:$0xff]  }
  0x2b   :  { %v244_v35 = vld [vmem:[%s482_s1] ss:$0 sm:$0xff]  ;;  %s389_s1 = smov [#allocation7]  }
  0x2c   :  { %56 = vadd.xlane.f32.xlu0 %v449_v1  ;;  %v245_v41 = vld [vmem:[%s483_s2] ss:$0 sm:$0xff]  ;;  %s231_s25 = sshll.u32 %s389_s1, 4  ;;  %s232_s25 = int_to_ptr.vmem [resolvable:$true] %s231_s25 }
  0x2d   :  { %267 = vmatpush3.bf16.msra.mxu0 %v294_v12  ;;  %v246_v46 = vld [vmem:[%s485_s4] ss:$0 sm:$0xff]  ;;  %s353_s2 = scalar_lea.vmem %s232_s25, 256  ;;  %p358_p3 = scmp.lt.s32.totalorder %s232_s25, %s232_s25 }
  0x2e   :  { %268 = vmatprep.subr.bf16.mxu0 %v387_v11  ;;  %p354_p2 = scmp.ne.s32.totalorder %s232_s25, %s353_s2  ;;  %p359_p4 = scmp.lt.s32.totalorder %s353_s2, %s353_s2 }
  0x30   :  { %p360_p5 = por %p359_p4, %p358_p3 }
  0x31   :  { %269 = vmatpush3.bf16.msra.mxu0 %v295_v13 }
  0x32   :  { %270 = vmatprep.subr.bf16.mxu0 %v387_v11  ;;  %p361_p6 = pnand %p360_p5, %p354_p2 }
  0x35   :  { %271 = vmatpush3.bf16.msra.mxu0 %v296_v14 }
  0x36   :  { %272 = vmatprep.subr.bf16.mxu0 %v387_v11 }
  0x39   :  { %273 = vmatpush3.bf16.msra.mxu0 %v297_v15 }
  0x3a   :  { %274 = vmatprep.subr.bf16.mxu0 %v387_v11 }
  0x3d   :  { %275 = vmatpush3.bf16.msra.mxu0 %v298_v16 }
  0x3e   :  { %276 = vmatprep.subr.bf16.mxu0 %v387_v11 }
  0x41   :  { %277 = vmatpush3.bf16.msra.mxu0 %v299_v17 }
  0x42   :  { %278 = vmatprep.subr.bf16.mxu0 %v387_v11 }
  0x45   :  { %279 = vmatpush3.bf16.msra.mxu0 %v300_v18 }
  0xb5   :  { %v55_v2 = vpop.xlane.xlu0 %54 }
  0xb6   :  { %v59_v3 = vmul.f32 0.0078125, %v55_v2 }
  0xb8   :  { %v61_v4 = vsub.f32 %v447_v0, %v59_v3 }
  0xb9   :  { %v57_v5 = vpop.xlane.xlu0 %56 }
  0xba   :  { %v60_v6 = vmul.f32 0.0078125, %v57_v5  ;;  %v63_v7 = vmul.f32 %v61_v4, %v61_v4  ;;  %v97_v37 = vmul.f32 %v244_v35, %v61_v4 }
  0xbc   :  { %v62_v8 = vsub.f32 %v449_v1, %v60_v6  ;;  %65 = vadd.xlane.f32.xlu1 %v63_v7 }
  0xbe   :  { %v64_v9 = vmul.f32 %v62_v8, %v62_v8  ;;  %v98_v38 = vmul.f32 %v244_v35, %v62_v8 }
  0xc0   :  { %67 = vadd.xlane.f32.xlu1 %v64_v9 }
 0x149   :  { %v66_v19 = vpop.xlane.xlu1 %65 }
 0x14a   :  { %v69_v20 = vmul.f32 0.007874016, %v66_v19 }
 0x14c   :  { %301 = vrsqrt.f32 %v69_v20  ;;  %vm73_vm1 = vcmp.eq.f32.partialorder %v69_v20, inf  ;;  %v76_v25 = vand.u32 2147483648, %v69_v20  ;;  %vm75_vm2 = vcmp.eq.f32.partialorder %v69_v20, 0.0 }
 0x14d   :  { %v68_v21 = vpop.xlane.xlu1 %67 }
 0x14e   :  { %v70_v22 = vmul.f32 0.007874016, %v68_v21 }
 0x150   :  { %303 = vrsqrt.f32 %v70_v22  ;;  %vm80_vm3 = vcmp.eq.f32.partialorder %v70_v22, inf  ;;  %v83_v31 = vand.u32 2147483648, %v70_v22  ;;  %vm82_vm4 = vcmp.eq.f32.partialorder %v70_v22, 0.0 }
 0x156   :  { %v302_v23 = vpop.eup %301 }
 0x157   :  { %v72_v24 = vmul.f32 %v302_v23, %v69_v20 }
 0x159   :  { %v74_v26 = vsel %vm73_vm1, %v69_v20, %v72_v24 }
 0x15a   :  { %v304_v27 = vpop.eup %303  ;;  %v77_v28 = vsel %vm75_vm2, %v76_v25, %v74_v26 }
 0x15b   :  { %v79_v29 = vmul.f32 %v304_v27, %v70_v22  ;;  %v85_v30 = vadd.f32 1e-06, %v77_v28 }
 0x15d   :  { %v81_v32 = vsel %vm80_vm3, %v70_v22, %v79_v29  ;;  %305 = vrcp.f32 %v85_v30 }
 0x15e   :  { %v84_v33 = vsel %vm82_vm4, %v83_v31, %v81_v32 }
 0x15f   :  { %v86_v34 = vadd.f32 1e-06, %v84_v33 }
 0x161   :  { %307 = vrcp.f32 %v86_v34 }
 0x167   :  { %v306_v36 = vpop.eup %305 }
 0x168   :  { %v99_v39 = vmul.f32 %v306_v36, %v97_v37 }
 0x16a   :  { %v107_v43 = vadd.f32 %v245_v41, %v99_v39 }
 0x16b   :  { %v308_v40 = vpop.eup %307 }
 0x16c   :  { %v100_v42 = vmul.f32 %v308_v40, %v98_v38 }
 0x16e   :  { %v108_v44 = vadd.f32 %v245_v41, %v100_v42 }
 0x170   :  { %v109_v45 = vpack.c.bf16 %v108_v44, %v107_v43 }
 0x172   :  { %281 = vmatmul.mubr.bf16.vlgmr.msra.gmra.mrb[0].mxu0 %v109_v45 }
 0x245   :  { %v215_v47 = vpop.f32.mrb[0].mxu0 }
 0x246   :  { %v216_v48 = vadd.f32 %v246_v46, %v215_v47  ;;  %v282_v49 = vpop.f32.mrb[1].mxu0 }
 0x247   :  { %v218_v50 = vpop.f32.mrb[2].mxu0 }
 0x248   :  { %v222_v51 = vadd.f32 %v216_v48, %v447_v0  ;;  %v219_v52 = vadd.f32 %v246_v46, %v218_v50  ;;  %v283_v53 = vpop.f32.mrb[3].mxu0 }
 0x24a   :  { %224 = vst [vmem:[#allocation7] sm:$0xff] %v222_v51  ;;  %v223_v54 = vadd.f32 %v219_v52, %v449_v1 }
 0x24c   :  { %225 = vst [vmem:[#allocation7 + $0x8] sm:$0xff] %v223_v54 }
 0x24d   :  { %364 = shalt.err (!%p361_p6)
}
 0x24e   :  { %s365_s27 = scalar_lea.hbm %s486_s5, 256 }
 0x24f   :  { %p366_p7 = scmp.ne.s32.totalorder %s486_s5, %s365_s27  ;;  %p369_p8 = scmp.lt.u32.totalorder %s365_s27, %s486_s5 }
 0x251   :  { %p371_p9 = pnand %p369_p8, %p366_p7 }
 0x253   :  { %374 = shalt.err (!%p371_p9)
}
 0x254   :  { %237 = dma.vmem_to_hbm [thread:$0]  %s232_s25, 256, %s486_s5, [#allocation4], %s382_s28, %s382_s28, %s383_s29  }
 0x255   :  { %379 = dma.done.wait [#allocation4], 256  }
 0x256   :  { %380 = vsyncadd [#allocation4], 4294967040 }
 0x257   :  { %241 = vsyncpa [#allocation3], 1 }
 0x258   :  { %242 = vsyncpa [#allocation6], 1 }
 0x259   :  { %243 = vsyncpa [#allocation4], 1 }

</bundles_post_ra>
